<compile_context>
chip_gen: v6e
topology: v6e:2x2x1
jax: 0.10.0
libtpu: 0.0.40
codegen_flags: <defaults>
</compile_context>

<pallas_src>
import numpy as np
import jax
import jax.numpy as jnp
from jax import lax
from jax.experimental import pallas as pl
from jax.experimental.pallas import tpu as pltpu


def _pair(x):
    return (x, x) if isinstance(x, int) else tuple(x)


def _round_up(x, m):
    return ((x + m - 1) // m) * m


def _make_corr_kernel(Cp, CC, oH, oW, kH, kW, dH, dW, dpH, dpW, patchW,
                      pw_group, scale, unroll_chunks):
    """Builds the per-(batch, patch-row) correlation kernel body."""
    win_h = (oH - 1) * dH + 1          # contiguous row span of one kernel tap
    win_w = (oW - 1) * dW + 1          # contiguous col span of one kernel tap
    n_chunks = Cp // CC
    strided = (dH != 1) or (dW != 1)

    def _win1(x1_ref, c0, i, j):
        a = x1_ref[0, pl.ds(c0, CC), i:i + win_h, j:j + win_w]
        if strided:
            # General-stride fallback path (dominant configs have dH=dW=1 and
            # skip this at trace time).
            a = a[:, ::dH, ::dW]
        return a.astype(jnp.float32)

    def _win2(x2_ref, c0, r0, col):
        b = x2_ref[0, pl.ds(c0, CC), pl.ds(r0, win_h), col:col + win_w]
        if strided:
            b = b[:, ::dH, ::dW]
        return b.astype(jnp.float32)

    def kernel(x1_ref, x2_ref, o_ref):
        # x1_ref : (1, Cp, H1p, W1p) padded input1; block index is constant
        #          across ph -> resident in VMEM, fetched once per batch elem.
        # x2_ref : (1, Cp, H2p, W2p) padded (pad + patch margin) input2, resident.
        # o_ref  : (1, 1, patchW, oH, oW) output block for this (b, ph).
        ph = pl.program_id(1)
        row0 = ph * dpH                 # input2 row shift for this patch row

        # Process pw shifts in small groups so the group's f32 accumulators
        # live entirely in vregs across every tap and channel chunk (no VMEM
        # scratch read-modify-write inside the compute loops).
        for g0 in range(0, patchW, pw_group):
            gcur = min(pw_group, patchW - g0)

            def accumulate(c0, accs, _g0=g0, _gcur=gcur, _row0=row0):
                accs = list(accs)
                for i in range(kH):
                    for j in range(kW):
                        # Hoisted over the pw group: one x1 window per tap/chunk.
                        a = _win1(x1_ref, c0, i, j)
                        for g in range(_gcur):
                            col = (_g0 + g) * dpW + j
                            b = _win2(x2_ref, c0, _row0 + i, col)
                            accs[g] = accs[g] + jnp.sum(a * b, axis=0)
                return tuple(accs)

            init = tuple(jnp.zeros((oH, oW), jnp.float32) for _ in range(gcur))
            if unroll_chunks:
                accs = init
                for ci in range(n_chunks):
                    accs = accumulate(ci * CC, accs)      # fully static indexing
            else:
                def body(ci, accs):
                    c0 = pl.multiple_of(ci * CC, CC)      # aligned chunk offset
                    return accumulate(c0, accs)
                accs = lax.fori_loop(0, n_chunks, body, init)

            # Exactly one store per pw (normalisation by C folded in here).
            for g in range(gcur):
                res = accs[g]
                if scale != 1.0:
                    res = res * scale
                o_ref[0, 0, g0 + g] = res.astype(o_ref.dtype)

    return kernel


def spatial_correlation_sample_pallas(input1, input2, kernel_size=1, patch_size=1,
                                      stride=1, padding=0, dilation_patch=1,
                                      keep_spatial_dims=False, normalise=True):
    kH, kW = _pair(kernel_size)
    patchH, patchW = _pair(patch_size)
    dH, dW = _pair(stride)
    padH, padW = _pair(padding)
    dpH, dpW = _pair(dilation_patch)

    B, C, iH, iW = input1.shape
    radH = (patchH - 1) // 2
    radW = (patchW - 1) // 2
    oH = (iH + 2 * padH - kH) // dH + 1
    oW = (iW + 2 * padW - kW) // dW + 1

    # Channels padded to a multiple of 8 so every channel chunk is whole
    # (8, 128) vregs; zero channels contribute nothing to the correlation.
    Cp = _round_up(C, 8)
    cpad = Cp - C

    # Explicit zero pads reproduce the CUDA op's out-of-bounds-as-zero
    # semantics so the kernel only does in-bounds slices.  Inputs keep their
    # native dtype (e.g. bf16) through the pad and the DMA; the kernel upcasts.
    in1p = jnp.pad(input1, ((0, 0), (0, cpad), (padH, padH), (padW, padW)))
    in2p = jnp.pad(
        input2,
        ((0, 0), (0, cpad),
         (padH + radH * dpH, padH + (patchH - 1 - radH) * dpH),
         (padW + radW * dpW, padW + (patchW - 1 - radW) * dpW)))

    H1p, W1p = in1p.shape[2], in1p.shape[3]
    H2p, W2p = in2p.shape[2], in2p.shape[3]

    # Channel chunk: largest of 32/16/8 dividing the padded channel count.
    CC = 32 if Cp % 32 == 0 else (16 if Cp % 16 == 0 else 8)
    n_chunks = Cp // CC
    unroll_chunks = n_chunks <= 8      # keep the chunk loop visible to the scheduler

    # pw register-group size: keep the group's f32 accumulators within ~64 KiB
    # of vector registers.
    pw_group = max(1, min(patchW, (64 * 1024) // max(4 * oH * oW, 1)))

    scale = (1.0 / C) if normalise else 1.0
    kernel = _make_corr_kernel(Cp, CC, oH, oW, kH, kW, dH, dW, dpH, dpW,
                               patchW, pw_group, scale, unroll_chunks)

    # VMEM budget, per TPU generation: ~112 MiB headroom on 128 MiB parts,
    # 0.75x capacity on 64 MiB parts (v7x-sized).
    try:
        vmem_cap = pltpu.get_tpu_info().vmem_capacity_bytes
    except Exception:  # conservative fallback
        vmem_cap = 64 * 1024 * 1024
    if vmem_cap >= 96 * 1024 * 1024:
        vmem_limit = int(min(vmem_cap - 16 * 1024 * 1024, 112 * 1024 * 1024))
    else:
        vmem_limit = int(0.75 * vmem_cap)

    # The big resident input blocks have a constant block index across ph, so
    # double-buffering them buys nothing; single-buffer when doubling would
    # not fit (protects the 64 MiB generation from OOM / forced spills).
    itemsize = int(jnp.dtype(in1p.dtype).itemsize)
    blk1 = Cp * H1p * W1p * itemsize
    blk2 = Cp * H2p * W2p * itemsize
    out_blk = patchW * oH * oW * 4
    need_double = 2 * (blk1 + blk2) + 2 * out_blk + (8 * 1024 * 1024)
    single_buffer_inputs = need_double > vmem_limit

    def _input_spec(block_shape):
        index_map = lambda b, ph: (b, 0, 0, 0)
        if single_buffer_inputs:
            try:
                return pl.BlockSpec(block_shape, index_map,
                                    pipeline_mode=pl.Buffered(1))
            except Exception:
                pass  # fall back to default buffering if unsupported
        return pl.BlockSpec(block_shape, index_map)

    out5 = pl.pallas_call(
        kernel,
        out_shape=jax.ShapeDtypeStruct((B, patchH, patchW, oH, oW), jnp.float32),
        grid_spec=pltpu.PrefetchScalarGridSpec(
            num_scalar_prefetch=0,
            grid=(B, patchH),
            in_specs=[
                _input_spec((1, Cp, H1p, W1p)),
                _input_spec((1, Cp, H2p, W2p)),
            ],
            out_specs=pl.BlockSpec((1, 1, patchW, oH, oW),
                                   lambda b, ph: (b, ph, 0, 0, 0)),
        ),
        compiler_params=pltpu.CompilerParams(
            dimension_semantics=("parallel", "parallel"),
            vmem_limit_bytes=vmem_limit),
    )(in1p, in2p)

    if not keep_spatial_dims:
        return out5.reshape(B, patchH * patchW, oH, oW)
    return out5


class SpatialCorrelationSampler:
    """JAX/Pallas port of the PyTorch SpatialCorrelationSampler (forward only)."""

    def __init__(self, kernel_size=1, patch_size=1, stride=1, padding=0,
                 dilation=1, dilation_patch=1, keep_spatial_dims=False,
                 normalise=True):
        # `dilation` is stored but (like the PyTorch module) never forwarded to
        # the correlation op, so the kernel dilation is effectively 1.
        self.kernel_size = kernel_size
        self.patch_size = patch_size
        self.stride = stride
        self.padding = padding
        self.dilation = dilation
        self.dilation_patch = dilation_patch
        self.keep_spatial_dims = keep_spatial_dims
        self.normalise = normalise

    def __call__(self, input1, input2):
        return spatial_correlation_sample_pallas(
            input1, input2,
            kernel_size=self.kernel_size,
            patch_size=self.patch_size,
            stride=self.stride,
            padding=self.padding,
            dilation_patch=self.dilation_patch,
            keep_spatial_dims=self.keep_spatial_dims,
            normalise=self.normalise,
        )


def _reference_np(in1, in2, kernel_size, patch_size, stride, padding,
                  dilation_patch, keep_spatial_dims, normalise):
    """Direct NumPy transcription of the C++/CUDA correlate_patch loop."""
    kH, kW = _pair(kernel_size)
    patchH, patchW = _pair(patch_size)
    dH, dW = _pair(stride)
    padH, padW = _pair(padding)
    dpH, dpW = _pair(dilation_patch)
    B, C, iH, iW = in1.shape
    radH = (patchH - 1) // 2
    radW = (patchW - 1) // 2
    oH = (iH + 2 * padH - kH) // dH + 1
    oW = (iW + 2 * padW - kW) // dW + 1
    out = np.zeros((B, patchH, patchW, oH, oW), np.float32)
    for b in range(B):
        for ph in range(patchH):
            for pw in range(patchW):
                su = (ph - radH) * dpH
                sv = (pw - radW) * dpW
                for h in range(oH):
                    for w in range(oW):
                        u = -padH + h * dH
                        v = -padW + w * dW
                        acc = 0.0
                        for i in range(kH):
                            i1 = u + i
                            i2 = i1 + su
                            if 0 <= i1 < iH and 0 <= i2 < iH:
                                for j in range(kW):
                                    j1 = v + j
                                    j2 = j1 + sv
                                    if 0 <= j1 < iW and 0 <= j2 < iW:
                                        acc += float(np.dot(in1[b, :, i1, j1],
                                                            in2[b, :, i2, j2]))
                        out[b, ph, pw, h, w] = acc
    if not keep_spatial_dims:
        out = out.reshape(B, patchH * patchW, oH, oW)
    if normalise:
        out = out / C
    return out


if __name__ == "__main__":
    key = jax.random.PRNGKey(0)
    k1, k2 = jax.random.split(key)
    B, C, H, W = 2, 4, 16, 16
    input1 = jax.random.normal(k1, (B, C, H, W), dtype=jnp.float32)
    input2 = jax.random.normal(k2, (B, C, H, W), dtype=jnp.float32)

    configs = [
        dict(kernel_size=1, patch_size=3, stride=1, padding=0,
             dilation_patch=2, keep_spatial_dims=False, normalise=True),
        dict(kernel_size=3, patch_size=3, stride=1, padding=1,
             dilation_patch=1, keep_spatial_dims=True, normalise=False),
    ]

    i1_np = np.asarray(input1)
    i2_np = np.asarray(input2)

    for cfg in configs:
        sampler = SpatialCorrelationSampler(
            kernel_size=cfg["kernel_size"], patch_size=cfg["patch_size"],
            stride=cfg["stride"], padding=cfg["padding"],
            dilation_patch=cfg["dilation_patch"],
            keep_spatial_dims=cfg["keep_spatial_dims"],
            normalise=cfg["normalise"])
        out = sampler(input1, input2)
        out = jax.block_until_ready(out)
        ref = _reference_np(
            i1_np, i2_np, cfg["kernel_size"], cfg["patch_size"], cfg["stride"],
            cfg["padding"], cfg["dilation_patch"], cfg["keep_spatial_dims"],
            cfg["normalise"])
        np.testing.assert_allclose(np.asarray(out), ref, rtol=1e-4, atol=1e-4)

    print("KERNEL_OK")
</pallas_src>

<mosaic_0001>
module attributes {stable_mosaic.version = 11 : i64} {
  func.func @kernel(%arg0: i32, %arg1: i32, %arg2: memref<1x8x16x16xf32, #tpu.memory_space<vmem>>, %arg3: memref<1x8x20x20xf32, #tpu.memory_space<vmem>>, %arg4: memref<1x1x3x16x16xf32, #tpu.memory_space<vmem>>) attributes {dimension_semantics = [#tpu.dimension_semantics<parallel>, #tpu.dimension_semantics<parallel>], iteration_bounds = array<i64: 2, 3>, scalar_prefetch = 0 : i64, scratch_operands = 0 : i64, tpu.core_type = #tpu.core_type<tc>, window_params = [{transform_indices = @transform_0, window_bounds = array<i64: 1, 8, 16, 16>}, {transform_indices = @transform_1, window_bounds = array<i64: 1, 8, 20, 20>}, {transform_indices = @transform_2, window_bounds = array<i64: 1, 1, 3, 16, 16>}]} {
    %c2_i32 = arith.constant 2 : i32
    %0 = arith.muli %arg1, %c2_i32 : i32
    %cst = arith.constant 0.000000e+00 : f32
    %1 = vector.broadcast %cst : f32 to vector<16x16xf32>
    %cst_0 = arith.constant 0.000000e+00 : f32
    %2 = vector.broadcast %cst_0 : f32 to vector<16x16xf32>
    %cst_1 = arith.constant 0.000000e+00 : f32
    %3 = vector.broadcast %cst_1 : f32 to vector<16x16xf32>
    %c0 = arith.constant 0 : index
    %c0_2 = arith.constant 0 : index
    %c0_3 = arith.constant 0 : index
    %c0_4 = arith.constant 0 : index
    %4 = vector.load %arg2[%c0, %c0_2, %c0_3, %c0_4] : memref<1x8x16x16xf32, #tpu.memory_space<vmem>>, vector<1x8x16x16xf32>
    %5 = vector.shape_cast %4 : vector<1x8x16x16xf32> to vector<8x16x16xf32>
    %c0_i32 = arith.constant 0 : i32
    %6 = arith.addi %0, %c0_i32 : i32
    %c0_5 = arith.constant 0 : index
    %c0_6 = arith.constant 0 : index
    %7 = arith.index_cast %6 : i32 to index
    %c0_7 = arith.constant 0 : index
    %8 = vector.load %arg3[%c0_5, %c0_6, %7, %c0_7] : memref<1x8x20x20xf32, #tpu.memory_space<vmem>>, vector<1x8x16x16xf32>
    %9 = vector.shape_cast %8 : vector<1x8x16x16xf32> to vector<8x16x16xf32>
    %10 = arith.mulf %5, %9 : vector<8x16x16xf32>
    %cst_8 = arith.constant dense<0.000000e+00> : vector<16x16xf32>
    %11 = vector.multi_reduction <add>, %10, %cst_8 [0] : vector<8x16x16xf32> to vector<16x16xf32>
    %12 = arith.addf %1, %11 : vector<16x16xf32>
    %c0_i32_9 = arith.constant 0 : i32
    %13 = arith.addi %0, %c0_i32_9 : i32
    %c0_10 = arith.constant 0 : index
    %c0_11 = arith.constant 0 : index
    %14 = arith.index_cast %13 : i32 to index
    %c2 = arith.constant 2 : index
    %15 = vector.load %arg3[%c0_10, %c0_11, %14, %c2] : memref<1x8x20x20xf32, #tpu.memory_space<vmem>>, vector<1x8x16x16xf32>
    %16 = vector.shape_cast %15 : vector<1x8x16x16xf32> to vector<8x16x16xf32>
    %17 = arith.mulf %5, %16 : vector<8x16x16xf32>
    %cst_12 = arith.constant dense<0.000000e+00> : vector<16x16xf32>
    %18 = vector.multi_reduction <add>, %17, %cst_12 [0] : vector<8x16x16xf32> to vector<16x16xf32>
    %19 = arith.addf %2, %18 : vector<16x16xf32>
    %c0_i32_13 = arith.constant 0 : i32
    %20 = arith.addi %0, %c0_i32_13 : i32
    %c0_14 = arith.constant 0 : index
    %c0_15 = arith.constant 0 : index
    %21 = arith.index_cast %20 : i32 to index
    %c4 = arith.constant 4 : index
    %22 = vector.load %arg3[%c0_14, %c0_15, %21, %c4] : memref<1x8x20x20xf32, #tpu.memory_space<vmem>>, vector<1x8x16x16xf32>
    %23 = vector.shape_cast %22 : vector<1x8x16x16xf32> to vector<8x16x16xf32>
    %24 = arith.mulf %5, %23 : vector<8x16x16xf32>
    %cst_16 = arith.constant dense<0.000000e+00> : vector<16x16xf32>
    %25 = vector.multi_reduction <add>, %24, %cst_16 [0] : vector<8x16x16xf32> to vector<16x16xf32>
    %26 = arith.addf %3, %25 : vector<16x16xf32>
    %cst_17 = arith.constant 2.500000e-01 : f32
    %27 = vector.broadcast %cst_17 : f32 to vector<16x16xf32>
    %28 = arith.mulf %12, %27 : vector<16x16xf32>
    %c0_18 = arith.constant 0 : index
    %c0_19 = arith.constant 0 : index
    %c0_20 = arith.constant 0 : index
    %c0_21 = arith.constant 0 : index
    %c0_22 = arith.constant 0 : index
    %29 = vector.load %arg4[%c0_18, %c0_19, %c0_20, %c0_21, %c0_22] : memref<1x1x3x16x16xf32, #tpu.memory_space<vmem>>, vector<1x1x1x16x16xf32>
    %30 = vector.shape_cast %29 : vector<1x1x1x16x16xf32> to vector<16x16xf32>
    %31 = vector.shape_cast %28 : vector<16x16xf32> to vector<1x1x1x16x16xf32>
    tpu.vector_store %arg4[%c0_18, %c0_19, %c0_20, %c0_21, %c0_22], %31 {strides = array<i32>} : memref<1x1x3x16x16xf32, #tpu.memory_space<vmem>>, vector<1x1x1x16x16xf32>,
    %cst_23 = arith.constant 2.500000e-01 : f32
    %32 = vector.broadcast %cst_23 : f32 to vector<16x16xf32>
    %33 = arith.mulf %19, %32 : vector<16x16xf32>
    %c0_24 = arith.constant 0 : index
    %c0_25 = arith.constant 0 : index
    %c1 = arith.constant 1 : index
    %c0_26 = arith.constant 0 : index
    %c0_27 = arith.constant 0 : index
    %34 = vector.load %arg4[%c0_24, %c0_25, %c1, %c0_26, %c0_27] : memref<1x1x3x16x16xf32, #tpu.memory_space<vmem>>, vector<1x1x1x16x16xf32>
    %35 = vector.shape_cast %34 : vector<1x1x1x16x16xf32> to vector<16x16xf32>
    %36 = vector.shape_cast %33 : vector<16x16xf32> to vector<1x1x1x16x16xf32>
    tpu.vector_store %arg4[%c0_24, %c0_25, %c1, %c0_26, %c0_27], %36 {strides = array<i32>} : memref<1x1x3x16x16xf32, #tpu.memory_space<vmem>>, vector<1x1x1x16x16xf32>,
    %cst_28 = arith.constant 2.500000e-01 : f32
    %37 = vector.broadcast %cst_28 : f32 to vector<16x16xf32>
    %38 = arith.mulf %26, %37 : vector<16x16xf32>
    %c0_29 = arith.constant 0 : index
    %c0_30 = arith.constant 0 : index
    %c2_31 = arith.constant 2 : index
    %c0_32 = arith.constant 0 : index
    %c0_33 = arith.constant 0 : index
    %39 = vector.load %arg4[%c0_29, %c0_30, %c2_31, %c0_32, %c0_33] : memref<1x1x3x16x16xf32, #tpu.memory_space<vmem>>, vector<1x1x1x16x16xf32>
    %40 = vector.shape_cast %39 : vector<1x1x1x16x16xf32> to vector<16x16xf32>
    %41 = vector.shape_cast %38 : vector<16x16xf32> to vector<1x1x1x16x16xf32>
    tpu.vector_store %arg4[%c0_29, %c0_30, %c2_31, %c0_32, %c0_33], %41 {strides = array<i32>} : memref<1x1x3x16x16xf32, #tpu.memory_space<vmem>>, vector<1x1x1x16x16xf32>,
    return
  }
  func.func @transform_0(%arg0: i32, %arg1: i32) -> (i32, i32, i32, i32) {
    %c0_i32 = arith.constant 0 : i32
    %c0_i32_0 = arith.constant 0 : i32
    %c0_i32_1 = arith.constant 0 : i32
    %c0_i32_2 = arith.constant 0 : i32
    return %arg0, %c0_i32, %c0_i32_0, %c0_i32_1 : i32, i32, i32, i32
  }
  func.func @transform_1(%arg0: i32, %arg1: i32) -> (i32, i32, i32, i32) {
    %c0_i32 = arith.constant 0 : i32
    %c0_i32_0 = arith.constant 0 : i32
    %c0_i32_1 = arith.constant 0 : i32
    %c0_i32_2 = arith.constant 0 : i32
    return %arg0, %c0_i32, %c0_i32_0, %c0_i32_1 : i32, i32, i32, i32
  }
  func.func @transform_2(%arg0: i32, %arg1: i32) -> (i32, i32, i32, i32, i32) {
    %c0_i32 = arith.constant 0 : i32
    %c0_i32_0 = arith.constant 0 : i32
    %c0_i32_1 = arith.constant 0 : i32
    %c0_i32_2 = arith.constant 0 : i32
    return %arg0, %arg1, %c0_i32, %c0_i32_0, %c0_i32_1 : i32, i32, i32, i32, i32
  }
}

</mosaic_0001>

<bundles_post_ra>
// kernel: tpu_custom_call.1
= control target key start
LH: loop header
LB: loop body
LE: loop exit
PB: predicated region body
PF: predicated region fallthrough
CT: control target
= control target key end

     0   :  { %7 = vsyncpa [#allocation3], 0  ;;  %s1153_s0 = inlined_call_operand.vmem [shape: f32[2,8,16,16], index: 0, kind: input, shape index: {}]   ;;  %s1154_s1 = inlined_call_operand.vmem [shape: f32[2,8,20,20], index: 1, kind: input, shape index: {}]   ;;  %s1155_s2 = inlined_call_operand.hbm [shape: f32[2,3,3,16,16], index: 2, kind: output, shape index: {}]  }
   0x1   :  { %9 = vsyncpa [#allocation3 + $0x1], 0  ;;  %s797_s9 = smov 0   ;;  %s799_s10 = smov 0  }
   0x2   :  { %s801_s11 = smov 0   ;;  %s803_s12 = smov 0  }
   0x3   :  { %s805_s13 = smov 0   ;;  %s807_s14 = smov 0  }
   0x4   :  { %s809_s15 = smov 0   ;;  %s811_s16 = smov 0  }
   0x5 LB: > { %s587_s17 = sadd.s32 4294967295, %s775_s16   ;;  %s588_s18 = sadd.s32 4294967294, %s775_s16   ;;  %s775_s16 = sphi %s811_s16, %s15_s16   ;;  %s771_s15 = sphi %s809_s15, %s1164_s15   ;;  %s767_s14 = sphi %s807_s14, %s1163_s14   ;;  %s763_s13 = sphi %s805_s13, %s1162_s13   ;;  %s759_s12 = sphi %s803_s12, %s1161_s12   ;;  %s755_s11 = sphi %s801_s11, %s1160_s11   ;;  %s751_s10 = sphi %s799_s10, %s1159_s10   ;;  %s747_s9 = sphi %s797_s9, %s1158_s9  }
   0x6   : > { %s24_s19 = sadd.s32 1, %s767_s14  ;;  %s27_s20 = sadd.s32 1, %s771_s15 }
   0x7   : > { %p25_p0 = scmp.ge.s32.totalorder %s24_s19, 3  ;;  %p98_p1 = scmp.ne.s32.totalorder %s755_s11, %s751_s10 }
   0x8   : > { %p99_p2 = scmp.eq.s32.totalorder %s587_s17, 5  ;;  %p104_p5 = scmp.ne.s32.totalorder %s751_s10, %s747_s9 }
   0x9   : > { %s1166_s19 = smov (%p25_p0, %s24_s19), 0  ;;  %s1168_s20 = smov (!%p25_p0, %s27_s20), %s771_s15 }
   0xa   : > { %s84_s21 = ssub.s32 %s767_s14, %s1166_s19  ;;  %p848_p3 = por %p99_p2, %p98_p1 }
   0xb   : > { %p29_p4 = scmp.ge.s32.totalorder %s1168_s20, 2  ;;  %p105_p6 = scmp.eq.s32.totalorder %s588_s18, 5 }
   0xc   : > { %p591_p7 = scmp.ge.s32.totalorder %s775_s16, 1  ;;  %p139_p9 = scmp.lt.s32.totalorder %s775_s16, 7 }
   0xd   : > { %s1170_s20 = smov (%p29_p4, %s1168_s20), 0  ;;  %p857_p8 = por %p105_p6, %p104_p5 }
   0xe   : > { %s83_s24 = ssub.s32 %s771_s15, %s1170_s20  ;;  %s88_s25 = sadd.s32 1, %s755_s11 }
   0xf   : > { %s85_s26 = sor.u32 %s84_s21, %s83_s24  ;;  %p140_p10 = pnand %p591_p7, %p139_p9 }
  0x10   : > { %p86_p11 = scmp.eq.s32.totalorder %s85_s26, 0  ;;  %p166_p12 = scmp.lt.s32.totalorder (!%p140_p10), %s763_s13, 1 }
  0x11   : > { %143 = sbr.rel (%p140_p10) target bundleno = 225 (0xe1), region = 28  ;;  %s595_s30 = sshll.u32 (!%p140_p10), %s759_s12, 1 }
  0x12   : > { %s866_s27 = scalar_select %p86_p11, %s755_s11, %s88_s25  }
  0x13   : > { %s777_s7 = smov (!%p140_p10), 126   ;;  %s778_s8 = smov (!%p140_p10), 124  }
  0x14   : > { %s163_s25 = sand.u32 (!%p140_p10), 1, %s751_s10  }
  0x15   : > { %s604_s26 = smul.u32 (!%p140_p10), 48, %s163_s25 }
  0x16   : > { %s167_s28 = scalar_select %p166_p12, %s763_s13, 1  ;;  %vm226_vm0 = vcmask 130048  }
  0x18   : > { %s605_s29 = smul.u32 192, %s167_s28  ;;  %s603_s17 = sshll.u32 %s167_s28, 7 }
  0x19   : > { %s893_s24 = scalar_lea.vmem %s1153_s0, %s603_s17  ;;  %s1006_s28 = scalar_lea.vmem [#allocation2], %s604_s26 }
  0x1a   : > { %s175_s5 = scalar_lea.vmem %s1154_s1, %s605_s29  ;;  %v896_v6 = vld [vmem:[%s893_s24 + $0x18] sm:$0xff]  ;;  %v899_v7 = vld [vmem:[%s893_s24 + $0x8] sm:$0xff]  ;;  %v906_v10 = vld [vmem:[%s893_s24 + $0x10] sm:$0xff]  ;;  %s606_s29 = smul.u32 6, %s759_s12 }
  0x1b   : > { %s874_s6 = scalar_lea.vmem %s175_s5, %s595_s30  ;;  %v910_v12 = vld [vmem:[%s893_s24] sm:$0xff]  ;;  %v913_v13 = vld [vmem:[%s893_s24 + $0x28] sm:$0xff]  ;;  %v928_v23 = vld [vmem:[%s893_s24 + $0x38] sm:$0xff]  ;;  %s607_s30 = smul.u32 18, %s763_s13 }
  0x1c   : > { %v196_v0 = vld [vmem:[%s874_s6 + $0x18] sm:$0xff]  ;;  %v194_v1 = vld [vmem:[%s874_s6] sm:$0xff]  ;;  %v195_v3 = vld [vmem:[%s874_s6 + $0x8] sm:$0xff]  ;;  %s497_s3 = sshll.u32 %s1006_s28, 4  ;;  %s779_s17 = smov [#allocation2]   ;;  %s1094_s3 = int_to_ptr.vmem [resolvable:$true] %s497_s3 }
  0x1d   : > { %279 = vrot.lane.b32.xlu1 %v196_v0, %s777_s7  ;;  %275 = vrot.lane.b32.xlu0 %v194_v1, %s777_s7  ;;  %v197_v2 = vld [vmem:[%s874_s6 + $0x20] sm:$0xff]  ;;  %v199_v4 = vld [vmem:[%s874_s6 + $0x38] sm:$0xff]  ;;  %v211_v9 = vmul.f32 %v195_v3, %v899_v7  ;;  %v212_v11 = vmul.f32 %v196_v0, %v906_v10  ;;  %v210_v14 = vmul.f32 %v194_v1, %v910_v12  ;;  %s494_s12 = sadd.s32 %s607_s30, %s606_s29  ;;  %s687_s18 = sshll.u32 %s779_s17, 4  ;;  %s688_s18 = int_to_ptr.vmem [resolvable:$false] %s687_s18 }
  0x1e   : > { %v198_v5 = vld [vmem:[%s874_s6 + $0x30] sm:$0xff]  ;;  %v213_v8 = vmul.f32 %v197_v2, %v896_v6  ;;  %v215_v17 = vmul.f32 %v199_v4, %v913_v13  ;;  %v200_v19 = vld [vmem:[%s874_s6 + $0x48] sm:$0xff]  ;;  %v925_v22 = vld [vmem:[%s893_s24 + $0x20] sm:$0xff]  ;;  %s600_s13 = sshll.u32 %s494_s12, 7  ;;  %s689_s21 = scalar_lea.vmem %s688_s18, 1536 }
  0x1f   : > { %v242_v16 = vsel %vm226_vm0, %v211_v9, 0.0  ;;  %v201_v18 = vld [vmem:[%s874_s6 + $0x50] sm:$0xff]  ;;  %v228_v20 = vsel %vm226_vm0, %v212_v11, 0.0  ;;  %v227_v24 = vsel %vm226_vm0, %v210_v14, 0.0  ;;  %v214_v26 = vmul.f32 %v198_v5, %v925_v22  ;;  %v203_v28 = vld [vmem:[%s874_s6 + $0x68] sm:$0xff]  ;;  %v202_v37 = vld [vmem:[%s874_s6 + $0x60] sm:$0xff]  ;;  %p690_p2 = scmp.lt.s32.totalorder %s1094_s3, %s688_s18 }
  0x20   : > { %v243_v15 = vsel %vm226_vm0, %v213_v8, 0.0  ;;  %v245_v25 = vsel %vm226_vm0, %v215_v17, 0.0  ;;  %v217_v27 = vmul.f32 %v201_v18, %v928_v23  ;;  %v229_v29 = vadd.f32 %v228_v20, %v227_v24  ;;  %v938_v31 = vld [vmem:[%s893_s24 + $0x30] sm:$0xff]  ;;  %v941_v32 = vld [vmem:[%s893_s24 + $0x48] sm:$0xff]  ;;  %v205_v38 = vld [vmem:[%s874_s6 + $0x80] sm:$0xff] }
  0x21   : > { %281 = vrot.lane.b32.xlu1 %v197_v2, %s777_s7  ;;  %277 = vrot.lane.b32.xlu0 %v195_v3, %s777_s7  ;;  %v244_v21 = vadd.f32 %v243_v15, %v242_v16  ;;  %v230_v33 = vsel %vm226_vm0, %v214_v26, 0.0  ;;  %v216_v35 = vmul.f32 %v200_v19, %v938_v31  ;;  %v219_v36 = vmul.f32 %v203_v28, %v941_v32  ;;  %v952_v41 = vld [vmem:[%s893_s24 + $0x40] sm:$0xff]  ;;  %v955_v42 = vld [vmem:[%s893_s24 + $0x58] sm:$0xff] }
  0x22   : > { %v247_v34 = vsel %vm226_vm0, %v217_v27, 0.0  ;;  %v231_v39 = vadd.f32 %v230_v33, %v229_v29  ;;  %v218_v45 = vmul.f32 %v202_v37, %v952_v41  ;;  %v221_v46 = vmul.f32 %v205_v38, %v955_v42  ;;  %v204_v47 = vld [vmem:[%s874_s6 + $0x78] sm:$0xff]  ;;  %v966_v51 = vld [vmem:[%s893_s24 + $0x50] sm:$0xff]  ;;  %v969_v52 = vld [vmem:[%s893_s24 + $0x68] sm:$0xff] }
  0x23   : > { %v246_v30 = vadd.f32 %v245_v25, %v244_v21  ;;  %v232_v43 = vsel %vm226_vm0, %v216_v35, 0.0  ;;  %v249_v44 = vsel %vm226_vm0, %v219_v36, 0.0  ;;  %v207_v48 = vld [vmem:[%s874_s6 + $0x98] sm:$0xff]  ;;  %v220_v55 = vmul.f32 %v204_v47, %v966_v51  ;;  %v206_v57 = vld [vmem:[%s874_s6 + $0x90] sm:$0xff]  ;;  %v979_v60 = vld [vmem:[%s893_s24 + $0x60] sm:$0xff] }
  0x24   : > { %v233_v49 = vadd.f32 %v232_v43, %v231_v39  ;;  %v234_v53 = vsel %vm226_vm0, %v218_v45, 0.0  ;;  %v251_v54 = vsel %vm226_vm0, %v221_v46, 0.0  ;;  %v223_v56 = vmul.f32 %v207_v48, %v969_v52  ;;  %v208_v9 = vld [vmem:[%s874_s6 + $0xa8] sm:$0xff]  ;;  %v1000_v15 = vld [vmem:[%s893_s24 + $0x70] sm:$0xff] }
  0x25   : > { %373 = vrot.lane.b32.xlu1 %v195_v3, %s778_s8  ;;  %371 = vrot.lane.b32.xlu0 %v194_v1, %s778_s8  ;;  %v248_v40 = vadd.f32 %v247_v34, %v246_v30  ;;  %v236_v61 = vsel %vm226_vm0, %v220_v55, 0.0  ;;  %v222_v63 = vmul.f32 %v206_v57, %v979_v60  ;;  %v989_v3 = vld [vmem:[%s893_s24 + $0x78] sm:$0xff]  ;;  %v224_v16 = vmul.f32 %v208_v9, %v1000_v15 }
  0x26   : > { %v235_v58 = vadd.f32 %v234_v53, %v233_v49  ;;  %v253_v62 = vsel %vm226_vm0, %v223_v56, 0.0 }
  0x27   : > { %v250_v50 = vadd.f32 %v249_v44, %v248_v40 }
  0x28   : > { %v237_v1 = vadd.f32 %v236_v61, %v235_v58 }
  0x29   : > { %377 = vrot.lane.b32.xlu1 %v197_v2, %s778_s8  ;;  %375 = vrot.lane.b32.xlu0 %v196_v0, %s778_s8  ;;  %v252_v59 = vadd.f32 %v251_v54, %v250_v50  ;;  %v209_v0 = vld [vmem:[%s874_s6 + $0xb0] sm:$0xff]  ;;  %s1092_s6 = scalar_lea.hbm %s1155_s2, %s600_s13 }
  0x2b   : > { %v254_v2 = vadd.f32 %v253_v62, %v252_v59 }
  0x2d   : > { %285 = vrot.lane.b32.xlu1 %v199_v4, %s777_s7  ;;  %283 = vrot.lane.b32.xlu0 %v198_v5, %s777_s7 }
  0x31   : > { %381 = vrot.lane.b32.xlu1 %v199_v4, %s778_s8  ;;  %379 = vrot.lane.b32.xlu0 %v198_v5, %s778_s8  ;;  %v238_v4 = vsel %vm226_vm0, %v222_v63, 0.0  ;;  %v225_v5 = vmul.f32 %v209_v0, %v989_v3 }
  0x32   : > { %v239_v11 = vadd.f32 %v238_v4, %v237_v1 }
  0x33   : > { %v255_v8 = vsel %vm226_vm0, %v225_v5, 0.0 }
  0x34   : > { %v256_v14 = vadd.f32 %v255_v8, %v254_v2 }
  0x35   : > { %289 = vrot.lane.b32.xlu1 %v201_v18, %s777_s7  ;;  %287 = vrot.lane.b32.xlu0 %v200_v19, %s777_s7 }
  0x36   : > { %v468_v17 = vmul.f32 0.25, %v256_v14 }
  0x38   : > { %470 = vst.msk [vmem:[%s1006_s28 + $0x8] sm:$0xff] %vm226_vm0, %v468_v17 }
  0x39   : > { %385 = vrot.lane.b32.xlu1 %v201_v18, %s778_s8  ;;  %383 = vrot.lane.b32.xlu0 %v200_v19, %s778_s8  ;;  %v240_v18 = vsel %vm226_vm0, %v224_v16, 0.0 }
  0x3a   : > { %v241_v19 = vadd.f32 %v240_v18, %v239_v11 }
  0x3c   : > { %v467_v20 = vmul.f32 0.25, %v241_v19 }
  0x3d   : > { %293 = vrot.lane.b32.xlu1 %v203_v28, %s777_s7  ;;  %291 = vrot.lane.b32.xlu0 %v202_v37, %s777_s7 }
  0x3e   : > { %469 = vst.msk [vmem:[%s1006_s28] sm:$0xff] %vm226_vm0, %v467_v20 }
  0x41   : > { %389 = vrot.lane.b32.xlu1 %v203_v28, %s778_s8  ;;  %387 = vrot.lane.b32.xlu0 %v202_v37, %s778_s8 }
  0x45   : > { %297 = vrot.lane.b32.xlu1 %v205_v38, %s777_s7  ;;  %295 = vrot.lane.b32.xlu0 %v204_v47, %s777_s7 }
  0x49   : > { %393 = vrot.lane.b32.xlu1 %v205_v38, %s778_s8  ;;  %391 = vrot.lane.b32.xlu0 %v204_v47, %s778_s8 }
  0x4d   : > { %301 = vrot.lane.b32.xlu1 %v207_v48, %s777_s7  ;;  %299 = vrot.lane.b32.xlu0 %v206_v57, %s777_s7 }
  0x51   : > { %397 = vrot.lane.b32.xlu1 %v207_v48, %s778_s8  ;;  %395 = vrot.lane.b32.xlu0 %v206_v57, %s778_s8 }
  0x55   : > { %305 = vrot.lane.b32.xlu1 %v209_v0, %s777_s7  ;;  %303 = vrot.lane.b32.xlu0 %v208_v9, %s777_s7  ;;  %s1102_s7 = scalar_lea.sflag [#allocation3], %s163_s25 }
  0x59   : > { %401 = vrot.lane.b32.xlu1 %v209_v0, %s778_s8  ;;  %399 = vrot.lane.b32.xlu0 %v208_v9, %s778_s8  ;;  %s683_s8 = scalar_lea.vmem %s1094_s3, 768 }
  0x5a   : > { %p684_p13 = scmp.ne.s32.totalorder %s1094_s3, %s683_s8  ;;  %p691_p4 = scmp.lt.s32.totalorder %s689_s21, %s683_s8 }
  0x5c   : > { %p685_p0 = pnand %p684_p13, %p848_p3  ;;  %p692_p5 = por %p691_p4, %p690_p2 }
  0x5e   : > { %p686_p1 = pneg %p685_p0 }
  0x60   : > { %p693_p6 = pnand %p692_p5, %p686_p1 }
  0x8f   : > { %v280_v21 = vpop.permute.xlu1 %279  ;;  %v276_v24 = vpop.permute.xlu0 %275 }
  0x90   : > { %v325_v47 = vmul.f32 %v280_v21, %v906_v10  ;;  %v323_v48 = vmul.f32 %v276_v24, %v910_v12 }
  0x92   : > { %v340_v62 = vsel %vm226_vm0, %v325_v47, 0.0  ;;  %v339_v63 = vsel %vm226_vm0, %v323_v48, 0.0 }
  0x93   : > { %v282_v25 = vpop.permute.xlu1 %281  ;;  %v278_v26 = vpop.permute.xlu0 %277  ;;  %v341_v17 = vadd.f32 %v340_v62, %v339_v63 }
  0x94   : > { %v326_v49 = vmul.f32 %v282_v25, %v896_v6  ;;  %v324_v50 = vmul.f32 %v278_v26, %v899_v7 }
  0x96   : > { %v355_v0 = vsel %vm226_vm0, %v326_v49, 0.0 }
  0x97   : > { %v374_v27 = vpop.permute.xlu1 %373  ;;  %v372_v28 = vpop.permute.xlu0 %371 }
  0x98   : > { %v420_v55 = vmul.f32 %v374_v27, %v899_v7  ;;  %v419_v56 = vmul.f32 %v372_v28, %v910_v12 }
  0x9a   : > { %v450_v2 = vsel %vm226_vm0, %v420_v55, 0.0  ;;  %v435_v4 = vsel %vm226_vm0, %v419_v56, 0.0 }
  0x9b   : > { %v378_v29 = vpop.permute.xlu1 %377  ;;  %v376_v30 = vpop.permute.xlu0 %375 }
  0x9c   : > { %v422_v53 = vmul.f32 %v378_v29, %v896_v6  ;;  %v421_v54 = vmul.f32 %v376_v30, %v906_v10  ;;  %v354_v6 = vsel %vm226_vm0, %v324_v50, 0.0 }
  0x9d   : > { %v356_v18 = vadd.f32 %v355_v0, %v354_v6 }
  0x9e   : > { %v451_v10 = vsel %vm226_vm0, %v422_v53, 0.0  ;;  %v436_v7 = vsel %vm226_vm0, %v421_v54, 0.0 }
  0x9f   : > { %v286_v33 = vpop.permute.xlu1 %285  ;;  %v284_v34 = vpop.permute.xlu0 %283  ;;  %v452_v19 = vadd.f32 %v451_v10, %v450_v2 }
  0xa0   : > { %v328_v59 = vmul.f32 %v286_v33, %v913_v13  ;;  %v327_v61 = vmul.f32 %v284_v34, %v925_v22 }
  0xa2   : > { %v357_v9 = vsel %vm226_vm0, %v328_v59, 0.0  ;;  %v342_v11 = vsel %vm226_vm0, %v327_v61, 0.0 }
  0xa3   : > { %v382_v35 = vpop.permute.xlu1 %381  ;;  %v380_v36 = vpop.permute.xlu0 %379  ;;  %v358_v25 = vadd.f32 %v357_v9, %v356_v18  ;;  %v343_v26 = vadd.f32 %v342_v11, %v341_v17 }
  0xa4   : > { %v424_v12 = vmul.f32 %v382_v35, %v913_v13  ;;  %v423_v1 = vmul.f32 %v380_v36, %v925_v22  ;;  %v437_v13 = vadd.f32 %v436_v7, %v435_v4 }
  0xa6   : > { %v453_v22 = vsel %vm226_vm0, %v424_v12, 0.0  ;;  %v438_v20 = vsel %vm226_vm0, %v423_v1, 0.0 }
  0xa7   : > { %v290_v37 = vpop.permute.xlu1 %289  ;;  %v288_v38 = vpop.permute.xlu0 %287 }
  0xa8   : > { %v330_v14 = vmul.f32 %v290_v37, %v928_v23  ;;  %v329_v16 = vmul.f32 %v288_v38, %v938_v31  ;;  %v454_v37 = vadd.f32 %v453_v22, %v452_v19  ;;  %v439_v38 = vadd.f32 %v438_v20, %v437_v13 }
  0xaa   : > { %v359_v33 = vsel %vm226_vm0, %v330_v14, 0.0  ;;  %v344_v34 = vsel %vm226_vm0, %v329_v16, 0.0 }
  0xab   : > { %v386_v39 = vpop.permute.xlu1 %385  ;;  %v384_v40 = vpop.permute.xlu0 %383  ;;  %v360_v47 = vadd.f32 %v359_v33, %v358_v25  ;;  %v345_v48 = vadd.f32 %v344_v34, %v343_v26 }
  0xac   : > { %v426_v27 = vmul.f32 %v386_v39, %v928_v23  ;;  %v425_v28 = vmul.f32 %v384_v40, %v938_v31 }
  0xae   : > { %v455_v49 = vsel %vm226_vm0, %v426_v27, 0.0  ;;  %v440_v50 = vsel %vm226_vm0, %v425_v28, 0.0 }
  0xaf   : > { %v294_v43 = vpop.permute.xlu1 %293  ;;  %v292_v44 = vpop.permute.xlu0 %291  ;;  %v456_v0 = vadd.f32 %v455_v49, %v454_v37 }
  0xb0   : > { %v332_v21 = vmul.f32 %v294_v43, %v941_v32  ;;  %v331_v24 = vmul.f32 %v292_v44, %v952_v41 }
  0xb2   : > { %v361_v23 = vsel %vm226_vm0, %v332_v21, 0.0  ;;  %v346_v31 = vsel %vm226_vm0, %v331_v24, 0.0 }
  0xb3   : > { %v390_v45 = vpop.permute.xlu1 %389  ;;  %v388_v46 = vpop.permute.xlu0 %387  ;;  %v362_v55 = vadd.f32 %v361_v23, %v360_v47  ;;  %v347_v56 = vadd.f32 %v346_v31, %v345_v48 }
  0xb4   : > { %v428_v43 = vmul.f32 %v390_v45, %v941_v32  ;;  %v427_v44 = vmul.f32 %v388_v46, %v952_v41 }
  0xb7   : > { %v298_v57 = vpop.permute.xlu1 %297  ;;  %v296_v58 = vpop.permute.xlu0 %295 }
  0xb8   : > { %v334_v35 = vmul.f32 %v298_v57, %v955_v42  ;;  %v333_v36 = vmul.f32 %v296_v58, %v966_v51  ;;  %v457_v57 = vsel %vm226_vm0, %v428_v43, 0.0  ;;  %v442_v58 = vsel %vm226_vm0, %v427_v44, 0.0 }
  0xba   : > { %v363_v41 = vsel %vm226_vm0, %v334_v35, 0.0  ;;  %v348_v45 = vsel %vm226_vm0, %v333_v36, 0.0 }
  0xbb   : > { %v394_v5 = vpop.permute.xlu1 %393  ;;  %v392_v8 = vpop.permute.xlu0 %391  ;;  %v364_v6 = vadd.f32 %v363_v41, %v362_v55 }
  0xbc   : > { %v430_v46 = vmul.f32 %v394_v5, %v955_v42  ;;  %v429_v54 = vmul.f32 %v392_v8, %v966_v51  ;;  %v441_v42 = vadd.f32 %v440_v50, %v439_v38  ;;  %v349_v51 = vadd.f32 %v348_v45, %v347_v56 }
  0xbd   : > { %v458_v5 = vadd.f32 %v457_v57, %v456_v0 }
  0xbe   : > { %v459_v12 = vsel %vm226_vm0, %v430_v46, 0.0  ;;  %v444_v1 = vsel %vm226_vm0, %v429_v54, 0.0  ;;  %v443_v8 = vadd.f32 %v442_v58, %v441_v42 }
  0xbf   : > { %v302_v29 = vpop.permute.xlu1 %301  ;;  %v300_v30 = vpop.permute.xlu0 %299  ;;  %v460_v17 = vadd.f32 %v459_v12, %v458_v5 }
  0xc0   : > { %v336_v39 = vmul.f32 %v302_v29, %v969_v52  ;;  %v335_v40 = vmul.f32 %v300_v30, %v979_v60  ;;  %v445_v18 = vadd.f32 %v444_v1, %v443_v8 }
  0xc2   : > { %v365_v59 = vsel %vm226_vm0, %v336_v39, 0.0  ;;  %v350_v61 = vsel %vm226_vm0, %v335_v40, 0.0 }
  0xc3   : > { %v398_v53 = vpop.permute.xlu1 %397  ;;  %v396_v32 = vpop.permute.xlu0 %395  ;;  %v351_v9 = vadd.f32 %v350_v61, %v349_v51 }
  0xc4   : > { %v432_v62 = vmul.f32 %v398_v53, %v969_v52  ;;  %v431_v63 = vmul.f32 %v396_v32, %v979_v60  ;;  %v366_v52 = vadd.f32 %v365_v59, %v364_v6 }
  0xc6   : > { %v461_v60 = vsel %vm226_vm0, %v432_v62, 0.0  ;;  %v446_v11 = vsel %vm226_vm0, %v431_v63, 0.0 }
  0xc7   : > { %v306_v10 = vpop.permute.xlu1 %305  ;;  %v304_v7 = vpop.permute.xlu0 %303  ;;  %v462_v25 = vadd.f32 %v461_v60, %v460_v17  ;;  %v447_v26 = vadd.f32 %v446_v11, %v445_v18 }
  0xc8   : > { %v338_v2 = vmul.f32 %v306_v10, %v989_v3  ;;  %v337_v4 = vmul.f32 %v304_v7, %v1000_v15 }
  0xca   : > { %v367_v14 = vsel %vm226_vm0, %v338_v2, 0.0  ;;  %v352_v16 = vsel %vm226_vm0, %v337_v4, 0.0 }
  0xcb   : > { %v368_v19 = vadd.f32 %v367_v14, %v366_v52  ;;  %v353_v13 = vadd.f32 %v352_v16, %v351_v9  ;;  %v402_v22 = vpop.permute.xlu1 %401  ;;  %v400_v20 = vpop.permute.xlu0 %399 }
  0xcc   : > { %v434_v21 = vmul.f32 %v402_v22, %v989_v3  ;;  %v433_v24 = vmul.f32 %v400_v20, %v1000_v15 }
  0xcd   : > { %v472_v27 = vmul.f32 0.25, %v368_v19  ;;  %v471_v28 = vmul.f32 0.25, %v353_v13 }
  0xce   : > { %v463_v29 = vsel %vm226_vm0, %v434_v21, 0.0  ;;  %v448_v30 = vsel %vm226_vm0, %v433_v24, 0.0 }
  0xcf   : > { %597 = vst.msk [vmem:[%s1006_s28 + $0x18] sm:$0xff] %vm226_vm0, %v472_v27  ;;  %596 = vst.msk [vmem:[%s1006_s28 + $0x10] sm:$0xff] %vm226_vm0, %v471_v28  ;;  %v464_v3 = vadd.f32 %v463_v29, %v462_v25  ;;  %v449_v15 = vadd.f32 %v448_v30, %v447_v26 }
  0xd1   : > { %v477_v33 = vmul.f32 0.25, %v464_v3  ;;  %v476_v34 = vmul.f32 0.25, %v449_v15 }
  0xd3   : > { %599 = vst.msk [vmem:[%s1006_s28 + $0x28] sm:$0xff] %vm226_vm0, %v477_v33  ;;  %598 = vst.msk [vmem:[%s1006_s28 + $0x20] sm:$0xff] %vm226_vm0, %v476_v34 }
  0xd4   : > { %696 = shalt.err (!%p693_p6)
}
  0xd5   : > { %s697_s24 = scalar_lea.hbm %s1092_s6, 768  ;;  %s701_s28 = scalar_lea.hbm %s1155_s2, 4608 }
  0xd6   : > { %p698_p7 = scmp.ne.s32.totalorder %s1092_s6, %s697_s24  ;;  %p702_p11 = scmp.lt.s32.totalorder %s1092_s6, %s1155_s2 }
  0xd7   : > { %p703_p12 = scmp.lt.s32.totalorder %s701_s28, %s697_s24 }
  0xd8   : > { %p699_p9 = pnand %p698_p7, %p848_p3 }
  0xd9   : > { %p704_p13 = por %p703_p12, %p702_p11 }
  0xda   : > { %p700_p10 = pneg %p699_p9 }
  0xdc   : > { %p705_p0 = pnand %p704_p13, %p700_p10 }
  0xde   : > { %708 = shalt.err (!%p705_p0)
}
  0xdf   : > { %s780_s12 = smov 128   ;;  %s781_s13 = smov 8  }
  0xe0   : > { %608 = dma.vmem_to_hbm [thread:$0]  (%p848_p3), %s1094_s3, 768, %s1092_s6, %s1102_s7, %s780_s12, %s780_s12, %s781_s13  }
  0xe1 PF: > { %p614_p1 = scmp.ge.s32.totalorder %s775_s16, 2  ;;  %s512_s4 = sand.u32 1, %s747_s9  }
  0xe2   : > { %s513_s5 = scalar_lea.sflag [#allocation3], %s512_s4 }
  0xe3   : > { %p611_p2 = pnand %p614_p1, %p857_p8 }
  0xe5   : > { %p612_p4 = pneg %p611_p2 }
  0xe7   : > { %742 = dma.done.wait (%p612_p4), %s513_s5, 768  }
  0xe8   : > { %744 = vsyncadd (%p612_p4), %s513_s5, 4294966528  ;;  %s15_s16 = sadd.s32 1, %s775_s16   ;;  %s1158_s9 = smov %s751_s10 }
  0xe9   : > { %p12_p5 = scmp.ge.s32.totalorder %s15_s16, 8   ;;  %s1159_s10 = smov %s755_s11 }
  0xea   : > { %s1160_s11 = smov %s866_s27  ;;  %s1161_s12 = smov %s767_s14 }
  0xeb   : > { %s1162_s13 = smov %s771_s15  ;;  %s1163_s14 = smov %s1166_s19 }
  0xec   : > { %s1164_s15 = smov %s1170_s20  ;;  %14 = sbr.rel (!%p12_p5) target bundleno = 5 (0x5), region = 69 }
  0xf1   :  { %518 = vsyncpa [#allocation3], 1 }
  0xf2   :  { %520 = vsyncpa [#allocation3 + $0x1], 1 }

</bundles_post_ra>
